<compile_context>
chip_gen: v7x
topology: tpu7x:2x2x1
jax: 0.10.0
libtpu: 0.0.40
codegen_flags: <defaults>
</compile_context>

<pallas_src>
import jax
import jax.numpy as jnp
from jax import lax
from jax.experimental import pallas as pl
from jax.experimental.pallas import tpu as pltpu

_LANE = 128
_VMEM_LIMIT = 48 * 1024 * 1024      # safe on v7x (64 MiB/TC), plenty for v5e/v6e
_RESIDENT_BUDGET = 40 * 1024 * 1024  # working-set budget for the fast path


def _round_up(x, m):
    return ((x + m - 1) // m) * m


def prepare_linear_params(weight, bias):
    """One-time init conversion from PyTorch nn.Linear (N, K) layout to (K, N)."""
    return weight.T, bias


# ---------------------------------------------------------------------------
# Fast path: weight fully VMEM-resident, 1-D grid over batch tiles.
# ---------------------------------------------------------------------------
def _resident_kernel(x_ref, wt_ref, b_ref, o_ref):
    # x_ref : (K, tm)  streamed batch tile of x (batch on lanes)
    # wt_ref: (K, N)   whole transposed weight (resident across the grid)
    # b_ref : (1, N)   whole bias (resident)
    # o_ref : (tm, N)  lane-dense output tile
    acc = lax.dot_general(
        x_ref[...], wt_ref[...],
        dimension_numbers=(((0,), (0,)), ((), ())),   # out[b,n] = sum_k x[k,b]*wt[k,n]
        preferred_element_type=jnp.float32,
    )
    o_ref[...] = (acc + b_ref[...].astype(jnp.float32)).astype(o_ref.dtype)


def _forward_weight_resident(x, weight_t, bias, *, tm_target):
    K, B = x.shape
    _, N = weight_t.shape

    # Batch tile: multiple of 128 (lane axis of x / sublane axis of out).
    tm = min(tm_target, _round_up(B, _LANE))
    # Keep >= 2 grid steps when B allows so both v7x TensorCores get work
    # (harmless on single-TC v5e/v6e).
    if B > _LANE and _round_up(B, _LANE) <= tm:
        tm = max(_LANE, _round_up(pl.cdiv(B, 2), _LANE))

    b_pad = _round_up(B, tm)
    if b_pad != B:
        x = jnp.pad(x, ((0, 0), (0, b_pad - B)))
    grid = (b_pad // tm,)

    out = pl.pallas_call(
        _resident_kernel,
        out_shape=jax.ShapeDtypeStruct((b_pad, N), x.dtype),
        grid=grid,
        in_specs=[
            pl.BlockSpec((K, tm), lambda i: (0, i)),   # stream x batch tiles
            pl.BlockSpec((K, N), lambda i: (0, 0)),    # resident weight
            pl.BlockSpec((1, N), lambda i: (0, 0)),    # resident bias
        ],
        out_specs=pl.BlockSpec((tm, N), lambda i: (i, 0)),
        compiler_params=pltpu.CompilerParams(
            dimension_semantics=("parallel",),
            vmem_limit_bytes=_VMEM_LIMIT,
        ),
        cost_estimate=pl.CostEstimate(
            flops=2 * b_pad * K * N,
            bytes_accessed=x.dtype.itemsize * (b_pad * K + K * N + N + b_pad * N),
            transcendentals=0,
        ),
    )(x, weight_t, bias.reshape(1, N))

    if b_pad != B:
        out = out[:B]
    return out.reshape(-1)   # .view(-1): row-major over (B, N)


# ---------------------------------------------------------------------------
# Fallback path: 3-D tiled grid with f32 accumulator (huge K*N only).
# ---------------------------------------------------------------------------
def _tiled_kernel(x_ref, wt_ref, b_ref, o_ref, acc_ref):
    k = pl.program_id(2)
    part = lax.dot_general(
        x_ref[...], wt_ref[...],
        dimension_numbers=(((0,), (0,)), ((), ())),
        preferred_element_type=jnp.float32,
    )

    @pl.when(k == 0)
    def _():
        acc_ref[...] = part          # assign, not zero-fill-then-accumulate

    @pl.when(k > 0)
    def _():
        acc_ref[...] += part

    @pl.when(k == pl.num_programs(2) - 1)
    def _():
        o_ref[...] = (acc_ref[...] + b_ref[...].astype(jnp.float32)).astype(o_ref.dtype)


def _forward_tiled(x, weight_t, bias, *, tm=512, tn=512, tk=512):
    K, B = x.shape
    _, N = weight_t.shape

    tm = min(tm, _round_up(B, _LANE))
    tn = min(tn, _round_up(N, _LANE))
    tk = min(tk, _round_up(K, _LANE))

    b_pad, n_pad, k_pad = _round_up(B, tm), _round_up(N, tn), _round_up(K, tk)
    if (k_pad, b_pad) != (K, B):
        x = jnp.pad(x, ((0, k_pad - K), (0, b_pad - B)))          # zero K-pad: exact
    if (k_pad, n_pad) != (K, N):
        weight_t = jnp.pad(weight_t, ((0, k_pad - K), (0, n_pad - N)))
    bias2 = (jnp.pad(bias, (0, n_pad - N)) if n_pad != N else bias).reshape(1, n_pad)

    grid = (b_pad // tm, n_pad // tn, k_pad // tk)

    out = pl.pallas_call(
        _tiled_kernel,
        out_shape=jax.ShapeDtypeStruct((b_pad, n_pad), x.dtype),
        grid=grid,
        in_specs=[
            pl.BlockSpec((tk, tm), lambda i, j, k: (k, i)),   # x    (K, B)
            pl.BlockSpec((tk, tn), lambda i, j, k: (k, j)),   # w^T  (K, N)
            pl.BlockSpec((1, tn),  lambda i, j, k: (0, j)),   # bias
        ],
        out_specs=pl.BlockSpec((tm, tn), lambda i, j, k: (i, j)),
        scratch_shapes=[pltpu.VMEM((tm, tn), jnp.float32)],
        compiler_params=pltpu.CompilerParams(
            dimension_semantics=("parallel", "parallel", "arbitrary"),
            vmem_limit_bytes=_VMEM_LIMIT,
        ),
        cost_estimate=pl.CostEstimate(
            flops=2 * b_pad * k_pad * n_pad,
            bytes_accessed=x.dtype.itemsize * (
                b_pad * k_pad * (n_pad // tn) + k_pad * n_pad + n_pad + b_pad * n_pad),
            transcendentals=0,
        ),
    )(x, weight_t, bias2)

    if (b_pad, n_pad) != (B, N):
        out = out[:B, :N]
    return out.reshape(-1)


# ---------------------------------------------------------------------------
# Dispatcher
# ---------------------------------------------------------------------------
def linear_regression_forward(x, weight_t, bias):
    """x: (inputSize, batch); weight_t: (inputSize, outputSize); bias: (outputSize,).

    Returns the flat (batch * outputSize,) vector, matching
    `self.linear(x.transpose(1, 0)).view(-1)` in the PyTorch module.
    """
    K, B = x.shape
    K2, N = weight_t.shape
    assert K == K2 and bias.shape == (N,)
    itemsize = x.dtype.itemsize

    def resident_bytes(tm):
        # 2x streamed x tile + 2x out tile (double-buffered) + resident W + bias.
        return itemsize * (2 * K * tm + 2 * tm * N + 2 * K * N + N)

    if resident_bytes(_LANE) <= _RESIDENT_BUDGET:
        tm_target = 512
        while tm_target > _LANE and resident_bytes(tm_target) > _RESIDENT_BUDGET:
            tm_target //= 2
        return _forward_weight_resident(x, weight_t, bias, tm_target=tm_target)
    return _forward_tiled(x, weight_t, bias)


if __name__ == "__main__":
    # Lane-aligned demo shapes: two batch tiles on the 1-D 'parallel' grid
    # (both v7x TensorCores busy), N = 128 keeps stores lane-dense.
    inputSize, outputSize, batch = 256, 128, 512

    key = jax.random.PRNGKey(0)
    kx, kw, kb = jax.random.split(key, 3)

    # x has shape (inputSize, batch) so that x.transpose(1, 0) feeds the Linear.
    x = jax.random.normal(kx, (inputSize, batch), dtype=jnp.float32)

    # PyTorch-style init: uniform(-1/sqrt(in), 1/sqrt(in)), PyTorch (N, K) layout.
    bound = 1.0 / (inputSize ** 0.5)
    weight = jax.random.uniform(kw, (outputSize, inputSize),
                                dtype=jnp.float32, minval=-bound, maxval=bound)
    bias = jax.random.uniform(kb, (outputSize,),
                              dtype=jnp.float32, minval=-bound, maxval=bound)

    # One-time parameter prep (init-time transpose of the small weight matrix).
    weight_t, bias_p = prepare_linear_params(weight, bias)

    fwd = jax.jit(linear_regression_forward)
    out = jax.block_until_ready(fwd(x, weight_t, bias_p))

    # Sanity check against a full-precision JAX reference of the original module.
    ref = (jnp.dot(x.T, weight.T, precision=lax.Precision.HIGHEST) + bias).reshape(-1)
    assert out.shape == (batch * outputSize,)
    assert jnp.allclose(out, ref, atol=1e-3, rtol=1e-3), \
        float(jnp.max(jnp.abs(out - ref)))

    print("KERNEL_OK")
</pallas_src>

<mosaic_0001>
module attributes {stable_mosaic.version = 11 : i64} {
  func.func @_resident_kernel(%arg0: i32, %arg1: memref<256x256xf32, #tpu.memory_space<vmem>>, %arg2: memref<256x128xf32, #tpu.memory_space<vmem>>, %arg3: memref<1x128xf32, #tpu.memory_space<vmem>>, %arg4: memref<256x128xf32, #tpu.memory_space<vmem>>) attributes {dimension_semantics = [#tpu.dimension_semantics<parallel>], iteration_bounds = array<i64: 2>, scalar_prefetch = 0 : i64, scratch_operands = 0 : i64, tpu.core_type = #tpu.core_type<tc>, window_params = [{transform_indices = @transform_0, window_bounds = array<i64: 256, 256>}, {pipeline_mode = #tpu.pipeline_mode<synchronous>, transform_indices = @transform_1, window_bounds = array<i64: 256, 128>}, {pipeline_mode = #tpu.pipeline_mode<synchronous>, transform_indices = @transform_2, window_bounds = array<i64: 1, 128>}, {transform_indices = @transform_3, window_bounds = array<i64: 256, 128>}]} {
    %c0 = arith.constant 0 : index
    %c0_0 = arith.constant 0 : index
    %0 = vector.load %arg1[%c0, %c0_0] : memref<256x256xf32, #tpu.memory_space<vmem>>, vector<256x256xf32>
    %c0_1 = arith.constant 0 : index
    %c0_2 = arith.constant 0 : index
    %1 = vector.load %arg2[%c0_1, %c0_2] : memref<256x128xf32, #tpu.memory_space<vmem>>, vector<256x128xf32>
    %cst = arith.constant dense<0.000000e+00> : vector<256x128xf32>
    %2 = tpu.matmul %0, %1, %cst {dimension_numbers = #tpu.dot_dimension_numbers<[0], [0], [1], [1], [0, 1, 1, 1], [], []>} : vector<256x256xf32>, vector<256x128xf32>, vector<256x128xf32> -> vector<256x128xf32>
    %c0_3 = arith.constant 0 : index
    %c0_4 = arith.constant 0 : index
    %3 = vector.load %arg3[%c0_3, %c0_4] : memref<1x128xf32, #tpu.memory_space<vmem>>, vector<1x128xf32>
    %4 = vector.broadcast %3 : vector<1x128xf32> to vector<256x128xf32>
    %5 = arith.addf %2, %4 : vector<256x128xf32>
    %c0_5 = arith.constant 0 : index
    %c0_6 = arith.constant 0 : index
    %6 = vector.load %arg4[%c0_5, %c0_6] : memref<256x128xf32, #tpu.memory_space<vmem>>, vector<256x128xf32>
    tpu.vector_store %arg4[%c0_5, %c0_6], %5 {strides = array<i32>} : memref<256x128xf32, #tpu.memory_space<vmem>>, vector<256x128xf32>,
    return
  }
  func.func @transform_0(%arg0: i32) -> (i32, i32) {
    %c0_i32 = arith.constant 0 : i32
    %c0_i32_0 = arith.constant 0 : i32
    return %c0_i32, %arg0 : i32, i32
  }
  func.func @transform_1(%arg0: i32) -> (i32, i32) {
    %c0_i32 = arith.constant 0 : i32
    %c0_i32_0 = arith.constant 0 : i32
    %c0_i32_1 = arith.constant 0 : i32
    return %c0_i32, %c0_i32_0 : i32, i32
  }
  func.func @transform_2(%arg0: i32) -> (i32, i32) {
    %c0_i32 = arith.constant 0 : i32
    %c0_i32_0 = arith.constant 0 : i32
    %c0_i32_1 = arith.constant 0 : i32
    return %c0_i32, %c0_i32_0 : i32, i32
  }
  func.func @transform_3(%arg0: i32) -> (i32, i32) {
    %c0_i32 = arith.constant 0 : i32
    %c0_i32_0 = arith.constant 0 : i32
    return %arg0, %c0_i32 : i32, i32
  }
}

</mosaic_0001>

<bundles_post_ra>
// kernel: linear_regression_forward.1
= control target key start
LH: loop header
LB: loop body
LE: loop exit
PB: predicated region body
PF: predicated region fallthrough
CT: control target
= control target key end

     0   :  { %8 = vsyncpa [#allocation3], 0  ;;  %s1711_s0 = inlined_call_operand.hbm [shape: f32[256,512], index: 0, kind: input, shape index: {}]   ;;  %s1712_s1 = inlined_call_operand.hbm [shape: f32[256,128], index: 1, kind: input, shape index: {}]   ;;  %s1713_s2 = inlined_call_operand.vmem [shape: f32[1,128], index: 2, kind: input, shape index: {}]   ;;  %s1714_s3 = inlined_call_operand.hbm [shape: f32[512,128], index: 3, kind: output, shape index: {}]  }
   0x1   :  { %10 = vsyncpa [#allocation3 + $0x1], 0 }
   0x2   :  { %11 = vsyncpa [#allocation6], 0 }
   0x3   :  { %12 = vsyncpa [#allocation4], 0 }
   0x4   :  { %14 = vsyncpa [#allocation4 + $0x1], 0  ;;  %s1340_s12 = smov 0   ;;  %s1342_s13 = smov 0  }
   0x5   :  { %s1344_s14 = smov 0   ;;  %s1346_s15 = smov 0  }
   0x6 LB: > { %s1361_s16 = sadd.s32 4294967295, %s1307_s15   ;;  %s791_s17 = sadd.s32 4294967294, %s1307_s15   ;;  %s1307_s15 = sphi %s1346_s15, %s1738_s15   ;;  %s1303_s14 = sphi %s1344_s14, %s1737_s14   ;;  %s1299_s13 = sphi %s1342_s13, %s1736_s13   ;;  %s1295_s12 = sphi %s1340_s12, %s1735_s12  }
   0x7   : > { %s1365_s18 = sadd.s32 1, %s1307_s15   ;;  %s27_s19 = sadd.s32 1, %s1303_s14 }
   0x8   : > { %s24_s20 = ssub.s32 %s1307_s15, %s1365_s18  ;;  %p34_p0 = scmp.ne.s32.totalorder %s1303_s14, %s1299_s13 }
   0x9   : > { %p25_p1 = scmp.eq.s32.totalorder %s24_s20, 0  ;;  %p35_p2 = scmp.eq.s32.totalorder %s1307_s15, 0 }
   0xa   : > { %p40_p3 = scmp.ne.s32.totalorder %s1299_s13, %s1295_s12  ;;  %p1715_p4 = scmp.eq.s32.totalorder %s1361_s16, 0 }
   0xb   : > { %s1377_s21 = scalar_select %p25_p1, %s1303_s14, %s27_s19  }
   0xc   : > { %p1379_p5 = por %p35_p2, %p34_p0  ;;  %p1385_p6 = por %p1715_p4, %p40_p3 }
   0xd   : > { %p106_p7 = scmp.eq.s32.totalorder %s1361_s16, 1  ;;  %p112_p8 = scmp.eq.s32.totalorder %s791_s17, 1 }
   0xe   : > { %s1719_s22 = scalar_select %p1379_p5, 1, 0 }
   0xf   : > { %s1720_s23 = scalar_select %p1385_p6, 1, 0 }
  0x10   : > { %p792_p9 = scmp.ge.s32.totalorder %s1307_s15, 1  ;;  %p119_p10 = scmp.lt.s32.totalorder %s1307_s15, 3 }
  0x11   : > { %p1392_p11 = por %p106_p7, %p34_p0  ;;  %p1396_p12 = por %p112_p8, %p40_p3 }
  0x12   : > { %p1400_p13 = pnand %p792_p9, %p119_p10  ;;  %s1309_s27 = smov [#allocation5]  }
  0x13   : > { %s1721_s24 = scalar_select %p1392_p11, 1, 0 }
  0x14   : > { %s1722_s25 = scalar_select %p1396_p12, 1, 0 }
  0x15   : > { %s1723_s26 = scalar_select %p1400_p13, 1, 0 }
  0x16   : > { %p898_p1 = pneg %p1400_p13  ;;  %s131_s28 = sshll.u32 %s1309_s27, 4  ;;  %s132_s28 = int_to_ptr.vmem [resolvable:$true] %s131_s28 }
  0x17   : > { %s148_s30 = sand.u32 1, %s1303_s14   ;;  %s1179_s6 = scalar_lea.hbm %s1712_s1, 4096 }
  0x18   : > { %p1408_p2 = pnand %p898_p1, %p1715_p4  ;;  %p1180_p7 = scmp.ne.s32.totalorder %s1712_s1, %s1179_s6 }
  0x19   : > { %p1186_p1 = scmp.lt.u32.totalorder %s1179_s6, %s1712_s1 }
  0x1a   : > { %p1181_p8 = pneg %p1408_p2 }
  0x1c   : > { %p1182_p9 = pnand %p1181_p8, %p1180_p7 }
  0x1e   : > { %p1183_p10 = pneg %p1182_p9 }
  0x20   : > { %p1188_p4 = pnand %p1186_p1, %p1183_p10 }
  0x22   : > { %1191 = shalt.err (!%p1188_p4)
}
  0x23   : > { %s1192_s11 = scalar_lea.vmem %s132_s28, 4096  ;;  %p1200_p11 = scmp.lt.s32.totalorder %s132_s28, %s132_s28 }
  0x24   : > { %p1193_p0 = scmp.ne.s32.totalorder %s132_s28, %s1192_s11  ;;  %p1201_p6 = scmp.lt.s32.totalorder %s1192_s11, %s1192_s11 }
  0x26   : > { %p1195_p3 = pnand %p1193_p0, %p1181_p8  ;;  %p1202_p13 = por %p1201_p6, %p1200_p11 }
  0x28   : > { %p1196_p12 = pneg %p1195_p3 }
  0x2a   : > { %p1203_p5 = pnand %p1202_p13, %p1196_p12 }
  0x2c   : > { %1206 = shalt.err (!%p1203_p5)
}
  0x2d   : > { %s1310_s17 = smov 128   ;;  %s1311_s19 = smov 8  }
  0x2e   : > { %901 = dma.hbm_to_vmem [thread:$0]  (!%p1408_p2), %s1712_s1, 4096, %s132_s28, [#allocation6], %s1310_s17, %s1310_s17, %s1311_s19  }
  0x2f   : > { %p1725_p4 = scmp.ne.s32.totalorder %s1719_s22, 0  ;;  %p1726_p7 = scmp.lt.s32.totalorder %s1307_s15, 2 }
  0x30   : > { %s795_s5 = sshll.u32 %s148_s30, 9  ;;  %s808_s6 = sshll.u32 %s1307_s15, 8 }
  0x31   : > { %p1435_p0 = pnand %p1726_p7, %p1725_p4  ;;  %s1443_s9 = scalar_lea.hbm %s1711_s0, %s808_s6 }
  0x32   : > { %s152_s28 = scalar_lea.vmem [#allocation2], %s795_s5  ;;  %s1447_s29 = scalar_lea.sflag [#allocation3], %s148_s30 }
  0x33   : > { %s159_s22 = sshll.u32 %s152_s28, 4  ;;  %s1207_s10 = scalar_lea.hbm %s1443_s9, 8192  ;;  %s1445_s22 = int_to_ptr.vmem [resolvable:$true] %s159_s22 }
  0x34   : > { %p1208_p5 = scmp.ne.s32.totalorder %s1443_s9, %s1207_s10  ;;  %p1209_p6 = pneg %p1435_p0 }
  0x35   : > { %s1212_s19 = scalar_lea.hbm %s1711_s0, 16384  ;;  %p1213_p13 = scmp.lt.u32.totalorder %s1443_s9, %s1711_s0 }
  0x36   : > { %p1210_p11 = pnand %p1209_p6, %p1208_p5  ;;  %p1214_p2 = scmp.lt.u32.totalorder %s1212_s19, %s1207_s10 }
  0x37   : > { %p1216_p8 = scmp.lt.u32.totalorder %s1207_s10, %s1443_s9 }
  0x38   : > { %p1211_p12 = pneg %p1210_p11  ;;  %p1215_p3 = por %p1214_p2, %p1213_p13 }
  0x3a   : > { %p1217_p9 = por %p1216_p8, %p1215_p3 }
  0x3c   : > { %p1218_p10 = pnand %p1217_p9, %p1211_p12 }
  0x3e   : > { %1221 = shalt.err (!%p1218_p10)
}
  0x3f   : > { %s1222_s30 = scalar_lea.vmem %s1445_s22, 8192  ;;  %s1312_s5 = smov [#allocation2]  }
  0x40   : > { %p1223_p1 = scmp.ne.s32.totalorder %s1445_s22, %s1222_s30  ;;  %s1227_s6 = sshll.u32 %s1312_s5, 4  ;;  %s1228_s6 = int_to_ptr.vmem [resolvable:$false] %s1227_s6 }
  0x41   : > { %s1229_s7 = scalar_lea.vmem %s1228_s6, 16384  ;;  %p1230_p5 = scmp.lt.s32.totalorder %s1445_s22, %s1228_s6 }
  0x42   : > { %p1225_p4 = pnand %p1223_p1, %p1209_p6  ;;  %p1231_p11 = scmp.lt.s32.totalorder %s1229_s7, %s1222_s30 }
  0x44   : > { %p1226_p7 = pneg %p1225_p4  ;;  %p1232_p13 = por %p1231_p11, %p1230_p5 }
  0x46   : > { %p1233_p2 = pnand %p1232_p13, %p1226_p7 }
  0x48   : > { %1236 = shalt.err (!%p1233_p2)
}
  0x49   : > { %s1313_s8 = smov 512   ;;  %s1314_s28 = smov 256  }
  0x4a   : > { %s1315_s10 = smov 16   ;;  %p1728_p6 = scmp.ne.s32.totalorder %s1723_s26, 0 }
  0x4b   : > { %905 = dma.hbm_to_vmem [thread:$0]  (!%p1435_p0), %s1443_s9, 8192, %s1445_s22, %s1447_s29, %s1313_s8, %s1314_s28, %s1315_s10  }
  0x4c   : > { %171 = sbr.rel (%p1728_p6) target bundleno = 511 (0x1ff), region = 32  ;;  %s1478_s11 = sand.u32 (!%p1728_p6), 1, %s1299_s13  }
  0x4d   : > { %s799_s17 = sshll.u32 (!%p1728_p6), %s1478_s11, 9  ;;  %s174_s19 = scalar_lea.sflag (!%p1728_p6), [#allocation3], %s1478_s11 }
  0x4e   : > { %s1482_s20 = scalar_lea.vmem (!%p1728_p6), [#allocation2], %s799_s17  ;;  %p1729_p12 = scmp.ne.s32.totalorder (!%p1728_p6), %s1720_s23, 0 }
  0x53   : > { %1282 = dma.done.wait (%p1729_p12), %s174_s19, 8192  }
  0x54   : > { %1284 = vsyncadd (%p1729_p12), %s174_s19, 4294959104  ;;  %p1730_p0 = scmp.eq.s32.totalorder %s1361_s16, 0 }
  0x56   : > { %1286 = dma.done.wait (%p1730_p0), [#allocation6], 4096   ;;  %p1731_p3 = pmov %p1730_p0 }
  0x57   : > { %v1316_v0 = vmov 0.0|0.0   ;;  %v238_v1 = vld [vmem:[%s1482_s20 + $0x100] sm:$0xff]  ;;  %v239_v2 = vld [vmem:[%s1482_s20 + $0x108] sm:$0xff]  ;;  %v240_v6 = vld [vmem:[%s1482_s20 + $0x110] sm:$0xff]  ;;  %s801_s23 = sshll.u32 %s1478_s11, 8  ;;  %s809_s22 = sshll.u32 %s1361_s16, 12 }
  0x58   : > { %1288 = vsyncadd (%p1731_p3), [#allocation6], 4294963200  ;;  %810 = vmatprep.subr.bf16.mxu0 %v1316_v0  ;;  %858 = vmatprep.subr.bf16.mxu1 %v1316_v0  ;;  %v206_v3 = vld [vmem:[%s1482_s20] sm:$0xff]  ;;  %v955_v4 = vpack.i.bf16 %v239_v2, %v238_v1  ;;  %v207_v5 = vld [vmem:[%s1482_s20 + $0x8] sm:$0xff]  ;;  %s1596_s9 = scalar_lea.vmem [#allocation7], %s801_s23  ;;  %s1661_s5 = scalar_lea.hbm %s1714_s3, %s809_s22 }
  0x59   : > { %v241_v7 = vld [vmem:[%s1482_s20 + $0x118] sm:$0xff]  ;;  %v1067_v8 = vpack.i.bf16 %v207_v5, %v206_v3  ;;  %v208_v9 = vld [vmem:[%s1482_s20 + $0x10] sm:$0xff]  ;;  %v242_v13 = vld [vmem:[%s1482_s20 + $0x120] sm:$0xff]  ;;  %s708_s29 = sshll.u32 %s1596_s9, 4  ;;  %s695_s16 = scalar_lea.sflag [#allocation4], %s1478_s11  ;;  %s1663_s29 = int_to_ptr.vmem [resolvable:$true] %s708_s29 }
  0x5a   : > { %v209_v10 = vld [vmem:[%s1482_s20 + $0x18] sm:$0xff]  ;;  %956 = vxpose.xlu0.b32.start [1/16] %v955_v4, 128  ;;  %v957_v11 = vpack.i.bf16 %v241_v7, %v240_v6  ;;  %v243_v14 = vld [vmem:[%s1482_s20 + $0x128] sm:$0xff]  ;;  %v210_v15 = vld [vmem:[%s1482_s20 + $0x20] sm:$0xff]  ;;  %s1237_s6 = scalar_lea.vmem %s1663_s29, 4096  ;;  %p1732_p9 = scmp.ne.s32.totalorder %s1721_s24, 0 }
  0x5b   : > { %1068 = vxpose.xlu1.b32.start [1/16] %v1067_v8, 128  ;;  %v1069_v12 = vpack.i.bf16 %v209_v10, %v208_v9  ;;  %v211_v16 = vld [vmem:[%s1482_s20 + $0x28] sm:$0xff]  ;;  %v959_v17 = vpack.i.bf16 %v243_v14, %v242_v13  ;;  %v244_v19 = vld [vmem:[%s1482_s20 + $0x130] sm:$0xff]  ;;  %v245_v20 = vld [vmem:[%s1482_s20 + $0x138] sm:$0xff]  ;;  %p1238_p8 = scmp.ne.s32.totalorder %s1663_s29, %s1237_s6  ;;  %s1317_s7 = smov [#allocation7]  }
  0x5c   : > { %v1071_v18 = vpack.i.bf16 %v211_v16, %v210_v15  ;;  %v212_v21 = vld [vmem:[%s1482_s20 + $0x30] sm:$0xff]  ;;  %v213_v22 = vld [vmem:[%s1482_s20 + $0x38] sm:$0xff]  ;;  %v961_v23 = vpack.i.bf16 %v245_v20, %v244_v19  ;;  %v246_v25 = vld [vmem:[%s1482_s20 + $0x140] sm:$0xff]  ;;  %s1241_s8 = sshll.u32 %s1317_s7, 4  ;;  %s1242_s8 = int_to_ptr.vmem [resolvable:$false] %s1241_s8 }
  0x5d   : > { %v1073_v24 = vpack.i.bf16 %v213_v22, %v212_v21  ;;  %v247_v26 = vld [vmem:[%s1482_s20 + $0x148] sm:$0xff]  ;;  %v214_v27 = vld [vmem:[%s1482_s20 + $0x40] sm:$0xff]  ;;  %v248_v31 = vld [vmem:[%s1482_s20 + $0x150] sm:$0xff]  ;;  %p1239_p10 = pnand %p1238_p8, %p1732_p9  ;;  %s1243_s28 = scalar_lea.vmem %s1242_s8, 8192 }
  0x5e   : > { %958 = vxpose.xlu0.b32.cont [2/16] %v957_v11, 128  ;;  %v215_v28 = vld [vmem:[%s1482_s20 + $0x48] sm:$0xff]  ;;  %v963_v29 = vpack.i.bf16 %v247_v26, %v246_v25  ;;  %v249_v32 = vld [vmem:[%s1482_s20 + $0x158] sm:$0xff]  ;;  %v216_v33 = vld [vmem:[%s1482_s20 + $0x50] sm:$0xff]  ;;  %p1244_p4 = scmp.lt.s32.totalorder %s1663_s29, %s1242_s8  ;;  %p1245_p7 = scmp.lt.s32.totalorder %s1243_s28, %s1237_s6 }
  0x5f   : > { %1070 = vxpose.xlu1.b32.cont [2/16] %v1069_v12, 128  ;;  %v1075_v30 = vpack.i.bf16 %v215_v28, %v214_v27  ;;  %v217_v34 = vld [vmem:[%s1482_s20 + $0x58] sm:$0xff]  ;;  %v965_v35 = vpack.i.bf16 %v249_v32, %v248_v31  ;;  %v250_v37 = vld [vmem:[%s1482_s20 + $0x160] sm:$0xff]  ;;  %v251_v38 = vld [vmem:[%s1482_s20 + $0x168] sm:$0xff]  ;;  %p1240_p1 = pneg %p1239_p10 }
  0x60   : > { %v1077_v36 = vpack.i.bf16 %v217_v34, %v216_v33  ;;  %v218_v39 = vld [vmem:[%s1482_s20 + $0x60] sm:$0xff]  ;;  %v219_v40 = vld [vmem:[%s1482_s20 + $0x68] sm:$0xff]  ;;  %v272_v44 = vld [vmem:[#allocation5 + $0x10] sm:$0xff]  ;;  %v967_v46 = vpack.i.bf16 %v251_v38, %v250_v37  ;;  %p1246_p5 = por %p1245_p7, %p1244_p4 }
  0x61   : > { %v270_v41 = vld [vmem:[#allocation5] sm:$0xff]  ;;  %v271_v42 = vld [vmem:[#allocation5 + $0x8] sm:$0xff]  ;;  %v273_v45 = vld [vmem:[#allocation5 + $0x18] sm:$0xff]  ;;  %v1079_v47 = vpack.i.bf16 %v219_v40, %v218_v39 }
  0x62   : > { %960 = vxpose.xlu0.b32.cont [3/16] %v959_v17, 128  ;;  %v811_v43 = vpack.c.bf16 %v271_v42, %v270_v41  ;;  %v252_v48 = vld [vmem:[%s1482_s20 + $0x170] sm:$0xff]  ;;  %v253_v49 = vld [vmem:[%s1482_s20 + $0x178] sm:$0xff]  ;;  %v814_v51 = vpack.c.bf16 %v273_v45, %v272_v44  ;;  %v274_v53 = vld [vmem:[#allocation5 + $0x20] sm:$0xff]  ;;  %p1247_p11 = pnand %p1246_p5, %p1240_p1 }
  0x63   : > { %1072 = vxpose.xlu1.b32.cont [3/16] %v1071_v18, 128  ;;  %v220_v50 = vld [vmem:[%s1482_s20 + $0x70] sm:$0xff]  ;;  %v221_v52 = vld [vmem:[%s1482_s20 + $0x78] sm:$0xff]  ;;  %v275_v54 = vld [vmem:[#allocation5 + $0x28] sm:$0xff]  ;;  %v969_v55 = vpack.i.bf16 %v253_v49, %v252_v48 }
  0x64   : > { %812 = vmatpush1.bf16.msra.mxu0 %v811_v43  ;;  %874 = vmatpush1.bf16.msra.mxu1 %v811_v43  ;;  %v1081_v56 = vpack.i.bf16 %v221_v52, %v220_v50  ;;  %v254_v57 = vld [vmem:[%s1482_s20 + $0x180] sm:$0xff]  ;;  %v255_v58 = vld [vmem:[%s1482_s20 + $0x188] sm:$0xff]  ;;  %v817_v60 = vpack.c.bf16 %v275_v54, %v274_v53  ;;  %v276_v62 = vld [vmem:[#allocation5 + $0x30] sm:$0xff] }
  0x65   : > { %813 = vmatprep.subr.bf16.mxu0 %v1316_v0  ;;  %859 = vmatprep.subr.bf16.mxu1 %v1316_v0  ;;  %v222_v59 = vld [vmem:[%s1482_s20 + $0x80] sm:$0xff]  ;;  %v223_v61 = vld [vmem:[%s1482_s20 + $0x88] sm:$0xff]  ;;  %v277_v63 = vld [vmem:[#allocation5 + $0x38] sm:$0xff]  ;;  %v971_v1 = vpack.i.bf16 %v255_v58, %v254_v57 }
  0x66   : > { %962 = vxpose.xlu0.b32.cont [4/16] %v961_v23, 128  ;;  %v1083_v2 = vpack.i.bf16 %v223_v61, %v222_v59  ;;  %v256_v3 = vld [vmem:[%s1482_s20 + $0x190] sm:$0xff]  ;;  %v257_v4 = vld [vmem:[%s1482_s20 + $0x198] sm:$0xff]  ;;  %v820_v6 = vpack.c.bf16 %v277_v63, %v276_v62  ;;  %v278_v8 = vld [vmem:[#allocation5 + $0x40] sm:$0xff] }
  0x67   : > { %1074 = vxpose.xlu1.b32.cont [4/16] %v1073_v24, 128  ;;  %v224_v5 = vld [vmem:[%s1482_s20 + $0x90] sm:$0xff]  ;;  %v225_v7 = vld [vmem:[%s1482_s20 + $0x98] sm:$0xff]  ;;  %v279_v9 = vld [vmem:[#allocation5 + $0x48] sm:$0xff]  ;;  %v973_v10 = vpack.i.bf16 %v257_v4, %v256_v3 }
  0x68   : > { %815 = vmatpush1.bf16.msra.mxu0 %v814_v51  ;;  %875 = vmatpush1.bf16.msra.mxu1 %v814_v51  ;;  %v1085_v11 = vpack.i.bf16 %v225_v7, %v224_v5  ;;  %v258_v12 = vld [vmem:[%s1482_s20 + $0x1a0] sm:$0xff]  ;;  %v259_v13 = vld [vmem:[%s1482_s20 + $0x1a8] sm:$0xff]  ;;  %v823_v15 = vpack.c.bf16 %v279_v9, %v278_v8  ;;  %v280_v17 = vld [vmem:[#allocation5 + $0x50] sm:$0xff] }
  0x69   : > { %816 = vmatprep.subr.bf16.mxu0 %v1316_v0  ;;  %860 = vmatprep.subr.bf16.mxu1 %v1316_v0  ;;  %v226_v14 = vld [vmem:[%s1482_s20 + $0xa0] sm:$0xff]  ;;  %v227_v16 = vld [vmem:[%s1482_s20 + $0xa8] sm:$0xff]  ;;  %v281_v18 = vld [vmem:[#allocation5 + $0x58] sm:$0xff]  ;;  %v975_v19 = vpack.i.bf16 %v259_v13, %v258_v12 }
  0x6a   : > { %964 = vxpose.xlu0.b32.cont [5/16] %v963_v29, 128  ;;  %v1087_v20 = vpack.i.bf16 %v227_v16, %v226_v14  ;;  %v260_v21 = vld [vmem:[%s1482_s20 + $0x1b0] sm:$0xff]  ;;  %v261_v22 = vld [vmem:[%s1482_s20 + $0x1b8] sm:$0xff]  ;;  %v826_v24 = vpack.c.bf16 %v281_v18, %v280_v17  ;;  %v282_v26 = vld [vmem:[#allocation5 + $0x60] sm:$0xff] }
  0x6b   : > { %1076 = vxpose.xlu1.b32.cont [5/16] %v1075_v30, 128  ;;  %v228_v23 = vld [vmem:[%s1482_s20 + $0xb0] sm:$0xff]  ;;  %v229_v25 = vld [vmem:[%s1482_s20 + $0xb8] sm:$0xff]  ;;  %v283_v27 = vld [vmem:[#allocation5 + $0x68] sm:$0xff]  ;;  %v977_v28 = vpack.i.bf16 %v261_v22, %v260_v21 }
  0x6c   : > { %818 = vmatpush1.bf16.msra.mxu0 %v817_v60  ;;  %876 = vmatpush1.bf16.msra.mxu1 %v817_v60  ;;  %v1089_v29 = vpack.i.bf16 %v229_v25, %v228_v23  ;;  %v262_v30 = vld [vmem:[%s1482_s20 + $0x1c0] sm:$0xff]  ;;  %v263_v31 = vld [vmem:[%s1482_s20 + $0x1c8] sm:$0xff]  ;;  %v829_v33 = vpack.c.bf16 %v283_v27, %v282_v26  ;;  %v264_v39 = vld [vmem:[%s1482_s20 + $0x1d0] sm:$0xff] }
  0x6d   : > { %819 = vmatprep.subr.bf16.mxu0 %v1316_v0  ;;  %861 = vmatprep.subr.bf16.mxu1 %v1316_v0  ;;  %v230_v32 = vld [vmem:[%s1482_s20 + $0xc0] sm:$0xff]  ;;  %v231_v34 = vld [vmem:[%s1482_s20 + $0xc8] sm:$0xff]  ;;  %v979_v37 = vpack.i.bf16 %v263_v31, %v262_v30  ;;  %v265_v40 = vld [vmem:[%s1482_s20 + $0x1d8] sm:$0xff] }
  0x6e   : > { %966 = vxpose.xlu0.b32.cont [6/16] %v965_v35, 128  ;;  %v284_v35 = vld [vmem:[#allocation5 + $0x70] sm:$0xff]  ;;  %v1091_v38 = vpack.i.bf16 %v231_v34, %v230_v32  ;;  %v233_v43 = vld [vmem:[%s1482_s20 + $0xd8] sm:$0xff]  ;;  %v286_v44 = vld [vmem:[#allocation5 + $0x80] sm:$0xff] }
  0x6f   : > { %1078 = vxpose.xlu1.b32.cont [6/16] %v1077_v36, 128  ;;  %v285_v36 = vld [vmem:[#allocation5 + $0x78] sm:$0xff]  ;;  %v232_v41 = vld [vmem:[%s1482_s20 + $0xd0] sm:$0xff]  ;;  %v287_v45 = vld [vmem:[#allocation5 + $0x88] sm:$0xff] }
  0x70   : > { %821 = vmatpush1.bf16.msra.mxu0 %v820_v6  ;;  %877 = vmatpush1.bf16.msra.mxu1 %v820_v6  ;;  %v832_v42 = vpack.c.bf16 %v285_v36, %v284_v35  ;;  %v266_v48 = vld [vmem:[%s1482_s20 + $0x1e0] sm:$0xff]  ;;  %v267_v49 = vld [vmem:[%s1482_s20 + $0x1e8] sm:$0xff]  ;;  %v835_v51 = vpack.c.bf16 %v287_v45, %v286_v44  ;;  %v288_v53 = vld [vmem:[#allocation5 + $0x90] sm:$0xff] }
  0x71   : > { %822 = vmatprep.subr.bf16.mxu0 %v1316_v0  ;;  %862 = vmatprep.subr.bf16.mxu1 %v1316_v0  ;;  %v234_v50 = vld [vmem:[%s1482_s20 + $0xe0] sm:$0xff]  ;;  %v235_v52 = vld [vmem:[%s1482_s20 + $0xe8] sm:$0xff]  ;;  %v289_v54 = vld [vmem:[#allocation5 + $0x98] sm:$0xff] }
  0x72   : > { %968 = vxpose.xlu0.b32.cont [7/16] %v967_v46, 128  ;;  %v981_v46 = vpack.i.bf16 %v265_v40, %v264_v39  ;;  %v268_v57 = vld [vmem:[%s1482_s20 + $0x1f0] sm:$0xff]  ;;  %v269_v58 = vld [vmem:[%s1482_s20 + $0x1f8] sm:$0xff]  ;;  %v838_v60 = vpack.c.bf16 %v289_v54, %v288_v53  ;;  %v290_v62 = vld [vmem:[#allocation5 + $0xa0] sm:$0xff] }
  0x73   : > { %1080 = vxpose.xlu1.b32.cont [7/16] %v1079_v47, 128  ;;  %v1093_v47 = vpack.i.bf16 %v233_v43, %v232_v41  ;;  %v236_v59 = vld [vmem:[%s1482_s20 + $0xf0] sm:$0xff]  ;;  %v237_v61 = vld [vmem:[%s1482_s20 + $0xf8] sm:$0xff]  ;;  %v291_v63 = vld [vmem:[#allocation5 + $0xa8] sm:$0xff] }
  0x74   : > { %824 = vmatpush1.bf16.msra.mxu0 %v823_v15  ;;  %878 = vmatpush1.bf16.msra.mxu1 %v823_v15  ;;  %v841_v3 = vpack.c.bf16 %v291_v63, %v290_v62  ;;  %v292_v4 = vld [vmem:[#allocation5 + $0xb0] sm:$0xff]  ;;  %v293_v5 = vld [vmem:[#allocation5 + $0xb8] sm:$0xff]  ;;  %v294_v7 = vld [vmem:[#allocation5 + $0xc0] sm:$0xff] }
  0x75   : > { %825 = vmatprep.subr.bf16.mxu0 %v1316_v0  ;;  %863 = vmatprep.subr.bf16.mxu1 %v1316_v0  ;;  %v844_v6 = vpack.c.bf16 %v293_v5, %v292_v4  ;;  %v295_v8 = vld [vmem:[#allocation5 + $0xc8] sm:$0xff]  ;;  %v298_v13 = vld [vmem:[#allocation5 + $0xe0] sm:$0xff]  ;;  %v300_v16 = vld [vmem:[#allocation5 + $0xf0] sm:$0xff] }
  0x76   : > { %970 = vxpose.xlu0.b32.cont [8/16] %v969_v55, 128  ;;  %v983_v55 = vpack.i.bf16 %v267_v49, %v266_v48  ;;  %v847_v9 = vpack.c.bf16 %v295_v8, %v294_v7  ;;  %v299_v14 = vld [vmem:[#allocation5 + $0xe8] sm:$0xff]  ;;  %v301_v17 = vld [vmem:[#allocation5 + $0xf8] sm:$0xff] }
  0x77   : > { %1082 = vxpose.xlu1.b32.cont [8/16] %v1081_v56, 128  ;;  %v1095_v56 = vpack.i.bf16 %v235_v52, %v234_v50  ;;  %v853_v15 = vpack.c.bf16 %v299_v14, %v298_v13  ;;  %v856_v18 = vpack.c.bf16 %v301_v17, %v300_v16 }
  0x78   : > { %827 = vmatpush1.bf16.msra.mxu0 %v826_v24  ;;  %879 = vmatpush1.bf16.msra.mxu1 %v826_v24 }
  0x79   : > { %828 = vmatprep.subr.bf16.mxu0 %v1316_v0  ;;  %864 = vmatprep.subr.bf16.mxu1 %v1316_v0 }
  0x7a   : > { %972 = vxpose.xlu0.b32.cont [9/16] %v971_v1, 128  ;;  %v985_v1 = vpack.i.bf16 %v269_v58, %v268_v57 }
  0x7b   : > { %1084 = vxpose.xlu1.b32.cont [9/16] %v1083_v2, 128  ;;  %v1097_v2 = vpack.i.bf16 %v237_v61, %v236_v59 }
  0x7c   : > { %830 = vmatpush1.bf16.msra.mxu0 %v829_v33  ;;  %880 = vmatpush1.bf16.msra.mxu1 %v829_v33 }
  0x7d   : > { %831 = vmatprep.subr.bf16.mxu0 %v1316_v0  ;;  %865 = vmatprep.subr.bf16.mxu1 %v1316_v0 }
  0x7e   : > { %974 = vxpose.xlu0.b32.cont [10/16] %v973_v10, 128  ;;  %v296_v10 = vld [vmem:[#allocation5 + $0xd0] sm:$0xff] }
  0x7f   : > { %1086 = vxpose.xlu1.b32.cont [10/16] %v1085_v11, 128  ;;  %v297_v11 = vld [vmem:[#allocation5 + $0xd8] sm:$0xff] }
  0x80   : > { %833 = vmatpush1.bf16.msra.mxu0 %v832_v42  ;;  %881 = vmatpush1.bf16.msra.mxu1 %v832_v42  ;;  %v850_v12 = vpack.c.bf16 %v297_v11, %v296_v10 }
  0x81   : > { %834 = vmatprep.subr.bf16.mxu0 %v1316_v0  ;;  %866 = vmatprep.subr.bf16.mxu1 %v1316_v0 }
  0x82   : > { %976 = vxpose.xlu0.b32.cont [11/16] %v975_v19, 128 }
  0x83   : > { %1088 = vxpose.xlu1.b32.cont [11/16] %v1087_v20, 128 }
  0x84   : > { %836 = vmatpush1.bf16.msra.mxu0 %v835_v51  ;;  %882 = vmatpush1.bf16.msra.mxu1 %v835_v51 }
  0x85   : > { %837 = vmatprep.subr.bf16.mxu0 %v1316_v0  ;;  %867 = vmatprep.subr.bf16.mxu1 %v1316_v0 }
  0x86   : > { %978 = vxpose.xlu0.b32.cont [12/16] %v977_v28, 128 }
  0x87   : > { %1090 = vxpose.xlu1.b32.cont [12/16] %v1089_v29, 128 }
  0x88   : > { %839 = vmatpush1.bf16.msra.mxu0 %v838_v60  ;;  %883 = vmatpush1.bf16.msra.mxu1 %v838_v60 }
  0x89   : > { %840 = vmatprep.subr.bf16.mxu0 %v1316_v0  ;;  %868 = vmatprep.subr.bf16.mxu1 %v1316_v0 }
  0x8a   : > { %980 = vxpose.xlu0.b32.cont [13/16] %v979_v37, 128 }
  0x8b   : > { %1092 = vxpose.xlu1.b32.cont [13/16] %v1091_v38, 128 }
  0x8c   : > { %842 = vmatpush1.bf16.msra.mxu0 %v841_v3  ;;  %884 = vmatpush1.bf16.msra.mxu1 %v841_v3 }
  0x8d   : > { %843 = vmatprep.subr.bf16.mxu0 %v1316_v0  ;;  %869 = vmatprep.subr.bf16.mxu1 %v1316_v0 }
  0x8e   : > { %982 = vxpose.xlu0.b32.cont [14/16] %v981_v46, 128 }
  0x8f   : > { %1094 = vxpose.xlu1.b32.cont [14/16] %v1093_v47, 128 }
  0x90   : > { %845 = vmatpush1.bf16.msra.mxu0 %v844_v6  ;;  %885 = vmatpush1.bf16.msra.mxu1 %v844_v6 }
  0x91   : > { %846 = vmatprep.subr.bf16.mxu0 %v1316_v0  ;;  %870 = vmatprep.subr.bf16.mxu1 %v1316_v0 }
  0x92   : > { %984 = vxpose.xlu0.b32.cont [15/16] %v983_v55, 128 }
  0x93   : > { %1096 = vxpose.xlu1.b32.cont [15/16] %v1095_v56, 128 }
  0x94   : > { %848 = vmatpush1.bf16.msra.mxu0 %v847_v9  ;;  %886 = vmatpush1.bf16.msra.mxu1 %v847_v9 }
  0x95   : > { %849 = vmatprep.subr.bf16.mxu0 %v1316_v0  ;;  %871 = vmatprep.subr.bf16.mxu1 %v1316_v0 }
  0x96   : > { %986 = vxpose.xlu0.b32.end [16/16] %v985_v1, 128 }
  0x97   : > { %1098 = vxpose.xlu1.b32.end [16/16] %v1097_v2, 128 }
  0x98   : > { %851 = vmatpush1.bf16.msra.mxu0 %v850_v12  ;;  %887 = vmatpush1.bf16.msra.mxu1 %v850_v12 }
  0x99   : > { %852 = vmatprep.subr.bf16.mxu0 %v1316_v0  ;;  %872 = vmatprep.subr.bf16.mxu1 %v1316_v0 }
  0x9c   : > { %854 = vmatpush1.bf16.msra.mxu0 %v853_v15  ;;  %888 = vmatpush1.bf16.msra.mxu1 %v853_v15 }
  0x9d   : > { %855 = vmatprep.subr.bf16.mxu0 %v1316_v0  ;;  %873 = vmatprep.subr.bf16.mxu1 %v1316_v0 }
  0xa0   : > { %857 = vmatpush1.bf16.msra.mxu0 %v856_v18  ;;  %889 = vmatpush1.bf16.msra.mxu1 %v856_v18 }
  0xda   : > { %v987_v19 = vpop.trf.xlu0 }
  0xdb   : > { %v1099_v20 = vpop.trf.xlu1  ;;  %v988_v21 = vunpack.i.l.bf16 %v987_v19  ;;  %v991_v22 = vunpack.i.h.bf16 %v987_v19 }
  0xdc   : > { %v1100_v23 = vunpack.i.l.bf16 %v1099_v20  ;;  %v1103_v24 = vunpack.i.h.bf16 %v1099_v20 }
  0xdd   : > { %501 = vmatprep.mubr.f32.mxu0 %v988_v21  ;;  %581 = vmatprep.mubr.f32.mxu1 %v991_v22 }
  0xde   : > { %v992_v25 = vpop.trf.xlu0  ;;  %502 = vmatmul.mubr.f32.vlgmr.msra.gmra.mrb[0].mxu0 %v1100_v23  ;;  %582 = vmatmul.mubr.f32.vlgmr.msra.gmra.mrb[0].mxu1 %v1103_v24 }
  0xdf   : > { %v1104_v26 = vpop.trf.xlu1  ;;  %v993_v27 = vunpack.i.l.bf16 %v992_v25  ;;  %v996_v28 = vunpack.i.h.bf16 %v992_v25 }
  0xe0   : > { %v1105_v29 = vunpack.i.l.bf16 %v1104_v26  ;;  %v1108_v30 = vunpack.i.h.bf16 %v1104_v26 }
  0xe1   : > { %506 = vmatprep.mubr.f32.mxu0 %v993_v27  ;;  %586 = vmatprep.mubr.f32.mxu1 %v996_v28 }
  0xe2   : > { %v997_v0 = vpop.trf.xlu0  ;;  %507 = vmatmul.mubr.f32.gmra.mrb[2].mxu0 %v1105_v29  ;;  %587 = vmatmul.mubr.f32.gmra.mrb[2].mxu1 %v1108_v30 }
  0xe3   : > { %v1109_v31 = vpop.trf.xlu1  ;;  %v998_v32 = vunpack.i.l.bf16 %v997_v0  ;;  %v1001_v33 = vunpack.i.h.bf16 %v997_v0 }
  0xe4   : > { %v1110_v34 = vunpack.i.l.bf16 %v1109_v31  ;;  %v1113_v35 = vunpack.i.h.bf16 %v1109_v31 }
  0xe5   : > { %511 = vmatprep.mubr.f32.mxu0 %v998_v32  ;;  %591 = vmatprep.mubr.f32.mxu1 %v1001_v33 }
  0xe6   : > { %v1002_v36 = vpop.trf.xlu0  ;;  %512 = vmatmul.mubr.f32.gmra.mrb[4].mxu0 %v1110_v34  ;;  %592 = vmatmul.mubr.f32.gmra.mrb[4].mxu1 %v1113_v35 }
  0xe7   : > { %v1114_v37 = vpop.trf.xlu1  ;;  %v1003_v38 = vunpack.i.l.bf16 %v1002_v36  ;;  %v1006_v39 = vunpack.i.h.bf16 %v1002_v36 }
  0xe8   : > { %v1115_v40 = vunpack.i.l.bf16 %v1114_v37  ;;  %v1118_v41 = vunpack.i.h.bf16 %v1114_v37 }
  0xe9   : > { %516 = vmatprep.mubr.f32.mxu0 %v1003_v38  ;;  %596 = vmatprep.mubr.f32.mxu1 %v1006_v39 }
  0xea   : > { %v1007_v42 = vpop.trf.xlu0  ;;  %517 = vmatmul.mubr.f32.gmra.mrb[6].mxu0 %v1115_v40  ;;  %597 = vmatmul.mubr.f32.gmra.mrb[6].mxu1 %v1118_v41 }
  0xeb   : > { %v1119_v43 = vpop.trf.xlu1  ;;  %v1008_v44 = vunpack.i.l.bf16 %v1007_v42  ;;  %v1011_v45 = vunpack.i.h.bf16 %v1007_v42 }
  0xec   : > { %v1120_v46 = vunpack.i.l.bf16 %v1119_v43  ;;  %v1123_v47 = vunpack.i.h.bf16 %v1119_v43 }
  0xed   : > { %521 = vmatprep.mubr.f32.mxu0 %v1008_v44  ;;  %601 = vmatprep.mubr.f32.mxu1 %v1011_v45 }
  0xee   : > { %v1012_v48 = vpop.trf.xlu0  ;;  %522 = vmatmul.mubr.f32.gmra.mrb[8].mxu0 %v1120_v46  ;;  %602 = vmatmul.mubr.f32.gmra.mrb[8].mxu1 %v1123_v47 }
  0xef   : > { %v1124_v49 = vpop.trf.xlu1  ;;  %v1013_v50 = vunpack.i.l.bf16 %v1012_v48  ;;  %v1016_v51 = vunpack.i.h.bf16 %v1012_v48 }
  0xf0   : > { %v1125_v52 = vunpack.i.l.bf16 %v1124_v49  ;;  %v1128_v53 = vunpack.i.h.bf16 %v1124_v49 }
  0xf1   : > { %526 = vmatprep.mubr.f32.mxu0 %v1013_v50  ;;  %606 = vmatprep.mubr.f32.mxu1 %v1016_v51  ;;  %v1592_v50 = vld [vmem:[%s1713_s2] ss:$0 sm:$0xff] }
  0xf2   : > { %v1017_v54 = vpop.trf.xlu0  ;;  %527 = vmatmul.mubr.f32.gmra.mrb[10].mxu0 %v1125_v52  ;;  %607 = vmatmul.mubr.f32.gmra.mrb[10].mxu1 %v1128_v53 }
  0xf3   : > { %v1129_v55 = vpop.trf.xlu1  ;;  %v1018_v56 = vunpack.i.l.bf16 %v1017_v54  ;;  %v1021_v57 = vunpack.i.h.bf16 %v1017_v54 }
  0xf4   : > { %v1130_v58 = vunpack.i.l.bf16 %v1129_v55  ;;  %v1133_v59 = vunpack.i.h.bf16 %v1129_v55 }
  0xf5   : > { %531 = vmatprep.mubr.f32.mxu0 %v1018_v56  ;;  %611 = vmatprep.mubr.f32.mxu1 %v1021_v57 }
  0xf6   : > { %v1022_v60 = vpop.trf.xlu0  ;;  %532 = vmatmul.mubr.f32.gmra.mrb[12].mxu0 %v1130_v58  ;;  %612 = vmatmul.mubr.f32.gmra.mrb[12].mxu1 %v1133_v59 }
  0xf7   : > { %v1134_v61 = vpop.trf.xlu1  ;;  %v1023_v62 = vunpack.i.l.bf16 %v1022_v60  ;;  %v1026_v63 = vunpack.i.h.bf16 %v1022_v60 }
  0xf8   : > { %v1135_v1 = vunpack.i.l.bf16 %v1134_v61  ;;  %v1138_v2 = vunpack.i.h.bf16 %v1134_v61 }
  0xf9   : > { %536 = vmatprep.mubr.f32.mxu0 %v1023_v62  ;;  %616 = vmatprep.mubr.f32.mxu1 %v1026_v63 }
  0xfa   : > { %v1027_v3 = vpop.trf.xlu0  ;;  %537 = vmatmul.mubr.f32.gmra.mrb[14].mxu0 %v1135_v1  ;;  %617 = vmatmul.mubr.f32.gmra.mrb[14].mxu1 %v1138_v2 }
  0xfb   : > { %v1139_v4 = vpop.trf.xlu1  ;;  %v1028_v5 = vunpack.i.l.bf16 %v1027_v3  ;;  %v1031_v6 = vunpack.i.h.bf16 %v1027_v3 }
  0xfc   : > { %v1140_v7 = vunpack.i.l.bf16 %v1139_v4  ;;  %v1143_v8 = vunpack.i.h.bf16 %v1139_v4 }
  0xfd   : > { %541 = vmatprep.mubr.f32.mxu0 %v1028_v5  ;;  %621 = vmatprep.mubr.f32.mxu1 %v1031_v6 }
  0xfe   : > { %v1032_v9 = vpop.trf.xlu0  ;;  %542 = vmatmul.mubr.f32.gmra.mrb[16].mxu0 %v1140_v7  ;;  %622 = vmatmul.mubr.f32.gmra.mrb[16].mxu1 %v1143_v8 }
  0xff   : > { %v1144_v10 = vpop.trf.xlu1  ;;  %v1033_v11 = vunpack.i.l.bf16 %v1032_v9  ;;  %v1036_v12 = vunpack.i.h.bf16 %v1032_v9 }
 0x100   : > { %v1145_v13 = vunpack.i.l.bf16 %v1144_v10  ;;  %v1148_v14 = vunpack.i.h.bf16 %v1144_v10 }
 0x101   : > { %546 = vmatprep.mubr.f32.mxu0 %v1033_v11  ;;  %626 = vmatprep.mubr.f32.mxu1 %v1036_v12 }
 0x102   : > { %v1037_v15 = vpop.trf.xlu0  ;;  %547 = vmatmul.mubr.f32.gmra.mrb[18].mxu0 %v1145_v13  ;;  %627 = vmatmul.mubr.f32.gmra.mrb[18].mxu1 %v1148_v14 }
 0x103   : > { %v1149_v16 = vpop.trf.xlu1  ;;  %v1038_v17 = vunpack.i.l.bf16 %v1037_v15  ;;  %v1041_v18 = vunpack.i.h.bf16 %v1037_v15 }
 0x104   : > { %v1150_v19 = vunpack.i.l.bf16 %v1149_v16  ;;  %v1153_v20 = vunpack.i.h.bf16 %v1149_v16 }
 0x105   : > { %551 = vmatprep.mubr.f32.mxu0 %v1038_v17  ;;  %631 = vmatprep.mubr.f32.mxu1 %v1041_v18 }
 0x106   : > { %v1042_v21 = vpop.trf.xlu0  ;;  %552 = vmatmul.mubr.f32.gmra.mrb[20].mxu0 %v1150_v19  ;;  %632 = vmatmul.mubr.f32.gmra.mrb[20].mxu1 %v1153_v20 }
 0x107   : > { %v1154_v22 = vpop.trf.xlu1  ;;  %v1043_v23 = vunpack.i.l.bf16 %v1042_v21  ;;  %v1046_v24 = vunpack.i.h.bf16 %v1042_v21 }
 0x108   : > { %v1155_v25 = vunpack.i.l.bf16 %v1154_v22  ;;  %v1158_v26 = vunpack.i.h.bf16 %v1154_v22 }
 0x109   : > { %556 = vmatprep.mubr.f32.mxu0 %v1043_v23  ;;  %636 = vmatprep.mubr.f32.mxu1 %v1046_v24 }
 0x10a   : > { %v1047_v27 = vpop.trf.xlu0  ;;  %557 = vmatmul.mubr.f32.gmra.mrb[22].mxu0 %v1155_v25  ;;  %637 = vmatmul.mubr.f32.gmra.mrb[22].mxu1 %v1158_v26 }
 0x10b   : > { %v1159_v28 = vpop.trf.xlu1  ;;  %v1048_v29 = vunpack.i.l.bf16 %v1047_v27  ;;  %v1051_v30 = vunpack.i.h.bf16 %v1047_v27 }
 0x10c   : > { %v1160_v0 = vunpack.i.l.bf16 %v1159_v28  ;;  %v1163_v31 = vunpack.i.h.bf16 %v1159_v28 }
 0x10d   : > { %561 = vmatprep.mubr.f32.mxu0 %v1048_v29  ;;  %641 = vmatprep.mubr.f32.mxu1 %v1051_v30 }
 0x10e   : > { %v1052_v32 = vpop.trf.xlu0  ;;  %562 = vmatmul.mubr.f32.gmra.mrb[24].mxu0 %v1160_v0  ;;  %642 = vmatmul.mubr.f32.gmra.mrb[24].mxu1 %v1163_v31 }
 0x10f   : > { %v1164_v33 = vpop.trf.xlu1  ;;  %v1053_v34 = vunpack.i.l.bf16 %v1052_v32  ;;  %v1056_v35 = vunpack.i.h.bf16 %v1052_v32 }
 0x110   : > { %v1165_v36 = vunpack.i.l.bf16 %v1164_v33  ;;  %v1168_v37 = vunpack.i.h.bf16 %v1164_v33 }
 0x111   : > { %566 = vmatprep.mubr.f32.mxu0 %v1053_v34  ;;  %646 = vmatprep.mubr.f32.mxu1 %v1056_v35 }
 0x112   : > { %v1057_v38 = vpop.trf.xlu0  ;;  %567 = vmatmul.mubr.f32.gmra.mrb[26].mxu0 %v1165_v36  ;;  %647 = vmatmul.mubr.f32.gmra.mrb[26].mxu1 %v1168_v37 }
 0x113   : > { %v1169_v39 = vpop.trf.xlu1  ;;  %v1058_v40 = vunpack.i.l.bf16 %v1057_v38  ;;  %v1061_v41 = vunpack.i.h.bf16 %v1057_v38 }
 0x114   : > { %v1170_v42 = vunpack.i.l.bf16 %v1169_v39  ;;  %v1173_v43 = vunpack.i.h.bf16 %v1169_v39 }
 0x115   : > { %571 = vmatprep.mubr.f32.mxu0 %v1058_v40  ;;  %651 = vmatprep.mubr.f32.mxu1 %v1061_v41 }
 0x116   : > { %v1062_v44 = vpop.trf.xlu0  ;;  %572 = vmatmul.mubr.f32.gmra.mrb[28].mxu0 %v1170_v42  ;;  %652 = vmatmul.mubr.f32.gmra.mrb[28].mxu1 %v1173_v43 }
 0x117   : > { %v1066_v45 = vunpack.i.h.bf16 %v1062_v44  ;;  %v1063_v46 = vunpack.i.l.bf16 %v1062_v44  ;;  %v1174_v47 = vpop.trf.xlu1 }
 0x118   : > { %v1178_v48 = vunpack.i.h.bf16 %v1174_v47  ;;  %v1175_v49 = vunpack.i.l.bf16 %v1174_v47 }
 0x119   : > { %576 = vmatprep.mubr.f32.mxu0 %v1063_v46  ;;  %656 = vmatprep.mubr.f32.mxu1 %v1066_v45 }
 0x11a   : > { %577 = vmatmul.mubr.f32.gmra.mrb[30].mxu0 %v1175_v49  ;;  %657 = vmatmul.mubr.f32.gmra.mrb[30].mxu1 %v1178_v48 }
 0x1b1   : > { %v503_v51 = vpop.f32.mrb[0].mxu0  ;;  %v583_v52 = vpop.f32.mrb[0].mxu1 }
 0x1b2   : > { %v504_v53 = vadd.f32 %v1592_v50, %v503_v51  ;;  %v584_v54 = vadd.f32 %v1592_v50, %v583_v52  ;;  %v505_v55 = vpop.f32.mrb[1].mxu0  ;;  %v585_v56 = vpop.f32.mrb[1].mxu1 }
 0x1b4   : > { %662 = vst [vmem:[%s1596_s9] sm:$0xff] %v504_v53  ;;  %678 = vst [vmem:[%s1596_s9 + $0x80] sm:$0xff] %v584_v54 }
 0x1b5   : > { %v508_v57 = vpop.f32.mrb[2].mxu0  ;;  %v588_v58 = vpop.f32.mrb[2].mxu1 }
 0x1b6   : > { %v509_v59 = vadd.f32 %v1592_v50, %v508_v57  ;;  %v589_v60 = vadd.f32 %v1592_v50, %v588_v58  ;;  %v510_v61 = vpop.f32.mrb[3].mxu0  ;;  %v590_v62 = vpop.f32.mrb[3].mxu1 }
 0x1b8   : > { %663 = vst [vmem:[%s1596_s9 + $0x8] sm:$0xff] %v509_v59  ;;  %679 = vst [vmem:[%s1596_s9 + $0x88] sm:$0xff] %v589_v60 }
 0x1b9   : > { %v513_v63 = vpop.f32.mrb[4].mxu0  ;;  %v593_v1 = vpop.f32.mrb[4].mxu1 }
 0x1ba   : > { %v514_v2 = vadd.f32 %v1592_v50, %v513_v63  ;;  %v594_v3 = vadd.f32 %v1592_v50, %v593_v1  ;;  %v515_v4 = vpop.f32.mrb[5].mxu0  ;;  %v595_v5 = vpop.f32.mrb[5].mxu1 }
 0x1bc   : > { %664 = vst [vmem:[%s1596_s9 + $0x10] sm:$0xff] %v514_v2  ;;  %680 = vst [vmem:[%s1596_s9 + $0x90] sm:$0xff] %v594_v3 }
 0x1bd   : > { %v518_v6 = vpop.f32.mrb[6].mxu0  ;;  %v598_v7 = vpop.f32.mrb[6].mxu1 }
 0x1be   : > { %v519_v8 = vadd.f32 %v1592_v50, %v518_v6  ;;  %v599_v9 = vadd.f32 %v1592_v50, %v598_v7  ;;  %v520_v10 = vpop.f32.mrb[7].mxu0  ;;  %v600_v11 = vpop.f32.mrb[7].mxu1 }
 0x1c0   : > { %665 = vst [vmem:[%s1596_s9 + $0x18] sm:$0xff] %v519_v8  ;;  %681 = vst [vmem:[%s1596_s9 + $0x98] sm:$0xff] %v599_v9 }
 0x1c1   : > { %v523_v12 = vpop.f32.mrb[8].mxu0  ;;  %v603_v13 = vpop.f32.mrb[8].mxu1 }
 0x1c2   : > { %v524_v14 = vadd.f32 %v1592_v50, %v523_v12  ;;  %v604_v15 = vadd.f32 %v1592_v50, %v603_v13  ;;  %v525_v16 = vpop.f32.mrb[9].mxu0  ;;  %v605_v17 = vpop.f32.mrb[9].mxu1 }
 0x1c4   : > { %666 = vst [vmem:[%s1596_s9 + $0x20] sm:$0xff] %v524_v14  ;;  %682 = vst [vmem:[%s1596_s9 + $0xa0] sm:$0xff] %v604_v15 }
 0x1c5   : > { %v528_v18 = vpop.f32.mrb[10].mxu0  ;;  %v608_v19 = vpop.f32.mrb[10].mxu1 }
 0x1c6   : > { %v529_v20 = vadd.f32 %v1592_v50, %v528_v18  ;;  %v609_v21 = vadd.f32 %v1592_v50, %v608_v19  ;;  %v530_v22 = vpop.f32.mrb[11].mxu0  ;;  %v610_v23 = vpop.f32.mrb[11].mxu1 }
 0x1c8   : > { %667 = vst [vmem:[%s1596_s9 + $0x28] sm:$0xff] %v529_v20  ;;  %683 = vst [vmem:[%s1596_s9 + $0xa8] sm:$0xff] %v609_v21 }
 0x1c9   : > { %v533_v24 = vpop.f32.mrb[12].mxu0  ;;  %v613_v25 = vpop.f32.mrb[12].mxu1 }
 0x1ca   : > { %v534_v26 = vadd.f32 %v1592_v50, %v533_v24  ;;  %v614_v27 = vadd.f32 %v1592_v50, %v613_v25  ;;  %v535_v28 = vpop.f32.mrb[13].mxu0  ;;  %v615_v29 = vpop.f32.mrb[13].mxu1 }
 0x1cc   : > { %668 = vst [vmem:[%s1596_s9 + $0x30] sm:$0xff] %v534_v26  ;;  %684 = vst [vmem:[%s1596_s9 + $0xb0] sm:$0xff] %v614_v27 }
 0x1cd   : > { %v538_v30 = vpop.f32.mrb[14].mxu0  ;;  %v618_v0 = vpop.f32.mrb[14].mxu1 }
 0x1ce   : > { %v539_v31 = vadd.f32 %v1592_v50, %v538_v30  ;;  %v619_v32 = vadd.f32 %v1592_v50, %v618_v0  ;;  %v540_v33 = vpop.f32.mrb[15].mxu0  ;;  %v620_v34 = vpop.f32.mrb[15].mxu1 }
 0x1d0   : > { %669 = vst [vmem:[%s1596_s9 + $0x38] sm:$0xff] %v539_v31  ;;  %685 = vst [vmem:[%s1596_s9 + $0xb8] sm:$0xff] %v619_v32 }
 0x1d1   : > { %v543_v35 = vpop.f32.mrb[16].mxu0  ;;  %v623_v36 = vpop.f32.mrb[16].mxu1 }
 0x1d2   : > { %v544_v37 = vadd.f32 %v1592_v50, %v543_v35  ;;  %v624_v38 = vadd.f32 %v1592_v50, %v623_v36  ;;  %v545_v39 = vpop.f32.mrb[17].mxu0  ;;  %v625_v40 = vpop.f32.mrb[17].mxu1 }
 0x1d4   : > { %670 = vst [vmem:[%s1596_s9 + $0x40] sm:$0xff] %v544_v37  ;;  %686 = vst [vmem:[%s1596_s9 + $0xc0] sm:$0xff] %v624_v38 }
 0x1d5   : > { %v548_v41 = vpop.f32.mrb[18].mxu0  ;;  %v628_v42 = vpop.f32.mrb[18].mxu1 }
 0x1d6   : > { %v549_v43 = vadd.f32 %v1592_v50, %v548_v41  ;;  %v629_v44 = vadd.f32 %v1592_v50, %v628_v42  ;;  %v550_v45 = vpop.f32.mrb[19].mxu0  ;;  %v630_v46 = vpop.f32.mrb[19].mxu1 }
 0x1d8   : > { %671 = vst [vmem:[%s1596_s9 + $0x48] sm:$0xff] %v549_v43  ;;  %687 = vst [vmem:[%s1596_s9 + $0xc8] sm:$0xff] %v629_v44 }
 0x1d9   : > { %v553_v47 = vpop.f32.mrb[20].mxu0  ;;  %v633_v48 = vpop.f32.mrb[20].mxu1 }
 0x1da   : > { %v554_v49 = vadd.f32 %v1592_v50, %v553_v47  ;;  %v634_v51 = vadd.f32 %v1592_v50, %v633_v48  ;;  %v555_v52 = vpop.f32.mrb[21].mxu0  ;;  %v635_v53 = vpop.f32.mrb[21].mxu1 }
 0x1dc   : > { %672 = vst [vmem:[%s1596_s9 + $0x50] sm:$0xff] %v554_v49  ;;  %688 = vst [vmem:[%s1596_s9 + $0xd0] sm:$0xff] %v634_v51 }
 0x1dd   : > { %v558_v54 = vpop.f32.mrb[22].mxu0  ;;  %v638_v55 = vpop.f32.mrb[22].mxu1 }
 0x1de   : > { %v559_v56 = vadd.f32 %v1592_v50, %v558_v54  ;;  %v639_v57 = vadd.f32 %v1592_v50, %v638_v55  ;;  %v560_v58 = vpop.f32.mrb[23].mxu0  ;;  %v640_v59 = vpop.f32.mrb[23].mxu1 }
 0x1e0   : > { %673 = vst [vmem:[%s1596_s9 + $0x58] sm:$0xff] %v559_v56  ;;  %689 = vst [vmem:[%s1596_s9 + $0xd8] sm:$0xff] %v639_v57 }
 0x1e1   : > { %v563_v60 = vpop.f32.mrb[24].mxu0  ;;  %v643_v61 = vpop.f32.mrb[24].mxu1 }
 0x1e2   : > { %v564_v62 = vadd.f32 %v1592_v50, %v563_v60  ;;  %v644_v63 = vadd.f32 %v1592_v50, %v643_v61  ;;  %v565_v1 = vpop.f32.mrb[25].mxu0  ;;  %v645_v2 = vpop.f32.mrb[25].mxu1 }
 0x1e4   : > { %674 = vst [vmem:[%s1596_s9 + $0x60] sm:$0xff] %v564_v62  ;;  %690 = vst [vmem:[%s1596_s9 + $0xe0] sm:$0xff] %v644_v63 }
 0x1e5   : > { %v568_v3 = vpop.f32.mrb[26].mxu0  ;;  %v648_v4 = vpop.f32.mrb[26].mxu1 }
 0x1e6   : > { %v569_v5 = vadd.f32 %v1592_v50, %v568_v3  ;;  %v649_v6 = vadd.f32 %v1592_v50, %v648_v4  ;;  %v570_v7 = vpop.f32.mrb[27].mxu0  ;;  %v650_v8 = vpop.f32.mrb[27].mxu1 }
 0x1e8   : > { %675 = vst [vmem:[%s1596_s9 + $0x68] sm:$0xff] %v569_v5  ;;  %691 = vst [vmem:[%s1596_s9 + $0xe8] sm:$0xff] %v649_v6 }
 0x1e9   : > { %v573_v9 = vpop.f32.mrb[28].mxu0  ;;  %v653_v10 = vpop.f32.mrb[28].mxu1 }
 0x1ea   : > { %v574_v11 = vadd.f32 %v1592_v50, %v573_v9  ;;  %v654_v12 = vadd.f32 %v1592_v50, %v653_v10  ;;  %v575_v13 = vpop.f32.mrb[29].mxu0  ;;  %v655_v14 = vpop.f32.mrb[29].mxu1 }
 0x1ec   : > { %676 = vst [vmem:[%s1596_s9 + $0x70] sm:$0xff] %v574_v11  ;;  %692 = vst [vmem:[%s1596_s9 + $0xf0] sm:$0xff] %v654_v12 }
 0x1ed   : > { %v578_v15 = vpop.f32.mrb[30].mxu0  ;;  %v658_v16 = vpop.f32.mrb[30].mxu1 }
 0x1ee   : > { %v579_v17 = vadd.f32 %v1592_v50, %v578_v15  ;;  %v659_v18 = vadd.f32 %v1592_v50, %v658_v16  ;;  %v580_v19 = vpop.f32.mrb[31].mxu0  ;;  %v660_v20 = vpop.f32.mrb[31].mxu1 }
 0x1f0   : > { %677 = vst [vmem:[%s1596_s9 + $0x78] sm:$0xff] %v579_v17  ;;  %693 = vst [vmem:[%s1596_s9 + $0xf8] sm:$0xff] %v659_v18 }
 0x1f1   : > { %1250 = shalt.err (!%p1247_p11)
}
 0x1f2   : > { %s1251_s10 = scalar_lea.hbm %s1661_s5, 4096  ;;  %s1255_s20 = scalar_lea.hbm %s1714_s3, 8192 }
 0x1f3   : > { %p1252_p13 = scmp.ne.s32.totalorder %s1661_s5, %s1251_s10  ;;  %p1256_p12 = scmp.lt.u32.totalorder %s1661_s5, %s1714_s3 }
 0x1f4   : > { %p1257_p0 = scmp.lt.u32.totalorder %s1255_s20, %s1251_s10  ;;  %p1259_p8 = scmp.lt.u32.totalorder %s1251_s10, %s1661_s5 }
 0x1f5   : > { %p1253_p2 = pnand %p1252_p13, %p1732_p9 }
 0x1f6   : > { %p1258_p3 = por %p1257_p0, %p1256_p12 }
 0x1f7   : > { %p1254_p6 = pneg %p1253_p2 }
 0x1f8   : > { %p1260_p10 = por %p1259_p8, %p1258_p3 }
 0x1fa   : > { %p1261_p1 = pnand %p1260_p10, %p1254_p6 }
 0x1fc   : > { %1264 = shalt.err (!%p1261_p1)
}
 0x1fd   : > { %s1318_s4 = smov 128   ;;  %s1319_s9 = smov 8  }
 0x1fe   : > { %896 = dma.vmem_to_hbm [thread:$0]  (%p1732_p9), %s1663_s29, 4096, %s1661_s5, %s695_s16, %s1318_s4, %s1318_s4, %s1319_s9  }
 0x1ff PF: > { %s723_s22 = sand.u32 1, %s1295_s12   ;;  %p1733_p4 = scmp.ne.s32.totalorder %s1722_s25, 0 }
 0x200   : > { %p1734_p7 = scmp.ge.s32.totalorder %s1307_s15, 2  ;;  %s724_s27 = scalar_lea.sflag [#allocation4], %s723_s22 }
 0x202   : > { %p907_p5 = pnand %p1734_p7, %p1733_p4 }
 0x204   : > { %1290 = dma.done.wait (!%p907_p5), %s724_s27, 4096  }
 0x205   : > { %1292 = vsyncadd (!%p907_p5), %s724_s27, 4294963200  ;;  %p17_p11 = scmp.ge.s32.totalorder %s1365_s18, 4   ;;  %s1735_s12 = smov %s1299_s13 }
 0x206   : > { %s1736_s13 = smov %s1303_s14  ;;  %s1737_s14 = smov %s1377_s21 }
 0x207   : > { %s1738_s15 = smov %s1365_s18  ;;  %19 = sbr.rel (!%p17_p11) target bundleno = 6 (0x6), region = 81 }
 0x20e   :  { %729 = vsyncpa [#allocation3], 1 }
 0x20f   :  { %731 = vsyncpa [#allocation3 + $0x1], 1 }
 0x210   :  { %732 = vsyncpa [#allocation6], 1 }
 0x211   :  { %733 = vsyncpa [#allocation4], 1 }
 0x212   :  { %735 = vsyncpa [#allocation4 + $0x1], 1 }

</bundles_post_ra>
